<compile_context>
chip_gen: v6e
topology: v6e:2x2x1
jax: 0.10.0
libtpu: 0.0.40
codegen_flags: <defaults>
</compile_context>

<pallas_src>
import functools
import math

import jax
import jax.numpy as jnp
from jax.experimental import pallas as pl
from jax.experimental.pallas import tpu as pltpu


def _round_up(x: int, m: int) -> int:
    return (x + m - 1) // m * m


def _cdiv(a: int, b: int) -> int:
    return (a + b - 1) // b


def _pad2d(a, rows, cols):
    return jnp.pad(a, ((0, rows - a.shape[0]), (0, cols - a.shape[1])))


# ---------------------------------------------------------------------------
# Capability probe: does this JAX build accept pipeline_mode=pl.Buffered(1)
# on a pallas_call BlockSpec?  (Used to single-buffer the constant weights.)
# ---------------------------------------------------------------------------
def _probe_single_buffering() -> bool:
    def _copy_kernel(x_ref, o_ref):
        o_ref[...] = x_ref[...]

    try:
        fn = pl.pallas_call(
            _copy_kernel,
            out_shape=jax.ShapeDtypeStruct((8, 128), jnp.float32),
            grid=(2,),
            in_specs=[pl.BlockSpec((8, 128), lambda i: (0, 0),
                                   pipeline_mode=pl.Buffered(1))],
            out_specs=pl.BlockSpec((8, 128), lambda i: (0, 0)),
        )
        jax.jit(fn).lower(jax.ShapeDtypeStruct((8, 128), jnp.float32))
        return True
    except Exception:
        return False


_SINGLE_BUFFER_OK = _probe_single_buffering()


def _const_spec(shape):
    """BlockSpec for a block that is identical for every batch tile."""
    if _SINGLE_BUFFER_OK:
        return pl.BlockSpec(shape, lambda i: (0, 0), pipeline_mode=pl.Buffered(1))
    return pl.BlockSpec(shape, lambda i: (0, 0))


# ---------------------------------------------------------------------------
# Kernel
# ---------------------------------------------------------------------------
def policy_mlp_kernel(x_ref, w1_ref, b1_ref, w2_ref, b2_ref, w3_ref, b3_ref,
                      o_ref):
    """relu(x@W1+b1) -> relu(@W2+b2) -> tanh(@W3+b3) on one batch tile.

    Matmul inputs are in the weights' dtype (bf16 for MXU-native throughput or
    f32 for exact semantics); accumulation, bias add, relu and tanh are f32.
    """
    cdt = w1_ref.dtype
    x = x_ref[...].astype(cdt)

    h1 = jnp.dot(x, w1_ref[...], preferred_element_type=jnp.float32) + b1_ref[...]
    h1 = jnp.maximum(h1, 0.0).astype(cdt)

    h2 = jnp.dot(h1, w2_ref[...], preferred_element_type=jnp.float32) + b2_ref[...]
    h2 = jnp.maximum(h2, 0.0).astype(cdt)

    h3 = jnp.dot(h2, w3_ref[...], preferred_element_type=jnp.float32) + b3_ref[...]
    o_ref[...] = jnp.tanh(h3).astype(o_ref.dtype)


# ---------------------------------------------------------------------------
# Parameter preparation (do this ONCE, not per forward call)
# ---------------------------------------------------------------------------
def prepare_policy_params(params, compute_dtype=jnp.bfloat16):
    """Zero-pad feature dims to multiples of 128 (lane-dense) and cast the
    matmul weights to `compute_dtype` (biases stay f32: they feed the f32
    accumulator).  Use compute_dtype=jnp.float32 for exact PyTorch parity.

    Returns (padded_param_tuple, num_actions)."""
    w1, b1, w2, b2, w3, b3 = params
    b1 = b1.reshape(1, -1)
    b2 = b2.reshape(1, -1)
    b3 = b3.reshape(1, -1)

    num_inputs, hidden = w1.shape
    num_actions = w3.shape[1]

    in_p = _round_up(num_inputs, 128)
    h_p = _round_up(hidden, 128)
    a_p = _round_up(num_actions, 128)

    padded = (
        _pad2d(w1, in_p, h_p).astype(compute_dtype),
        _pad2d(b1, 1, h_p).astype(jnp.float32),
        _pad2d(w2, h_p, h_p).astype(compute_dtype),
        _pad2d(b2, 1, h_p).astype(jnp.float32),
        _pad2d(w3, h_p, a_p).astype(compute_dtype),
        _pad2d(b3, 1, a_p).astype(jnp.float32),
    )
    return padded, num_actions


# ---------------------------------------------------------------------------
# Forward
# ---------------------------------------------------------------------------
@functools.partial(jax.jit, static_argnames=("num_actions", "block_batch"))
def _policy_forward_impl(state, w1_p, b1_p, w2_p, b2_p, w3_p, b3_p, *,
                         num_actions, block_batch):
    B = state.shape[0]
    in_p, h_p = w1_p.shape
    a_p = w3_p.shape[1]
    cdt = w1_p.dtype
    w_isize = jnp.dtype(cdt).itemsize

    # --- batch tiling: sublane-rounded, minimal last-tile padding, >=2 tiles
    #     when possible so both v7x TensorCores get work along the parallel
    #     batch axis.  block_batch ~256-512 is the sweet spot; bigger only
    #     adds VMEM pressure for the f32 intermediates.
    sublane = 16 if cdt == jnp.bfloat16 else 8
    n_tiles = _cdiv(B, block_batch)
    if B >= 2 * sublane:
        n_tiles = max(n_tiles, 2)
    tb = _round_up(_cdiv(B, n_tiles), sublane)
    b_p = _round_up(B, tb)
    grid = (b_p // tb,)

    # Per-call state padding (state stays f32; cast to cdt inside the kernel).
    x_p = _pad2d(state, b_p, in_p)

    cost = pl.CostEstimate(
        flops=2 * b_p * (in_p * h_p + h_p * h_p + h_p * a_p),
        transcendentals=b_p * a_p,  # tanh
        bytes_accessed=(b_p * in_p * 4
                        + (in_p * h_p + h_p * h_p + h_p * a_p) * w_isize
                        + (2 * h_p + a_p) * 4
                        + b_p * a_p * w_isize),
    )

    # VMEM footprint estimate: single-buffered weights + biases, double-
    # buffered state/output tiles, f32 intermediates.  Keeps v5e (16 MiB
    # default scoped VMEM) safe when hidden grows.
    vmem_est = ((in_p * h_p + h_p * h_p + h_p * a_p) * w_isize
                + (2 * h_p + a_p) * 4
                + 2 * tb * in_p * 4
                + 2 * tb * a_p * w_isize
                + 2 * tb * h_p * 4)
    vmem_limit = int(min(max(2 * vmem_est, 32 << 20), 100 << 20))

    out_padded = pl.pallas_call(
        policy_mlp_kernel,
        out_shape=jax.ShapeDtypeStruct((b_p, a_p), cdt),
        grid=grid,
        in_specs=[
            pl.BlockSpec((tb, in_p), lambda i: (i, 0)),  # state: batch-tiled
            _const_spec((in_p, h_p)),                    # weights/biases stay
            _const_spec((1, h_p)),                       # VMEM-resident across
            _const_spec((h_p, h_p)),                     # batch tiles
            _const_spec((1, h_p)),
            _const_spec((h_p, a_p)),
            _const_spec((1, a_p)),
        ],
        out_specs=pl.BlockSpec((tb, a_p), lambda i: (i, 0)),
        compiler_params=pltpu.CompilerParams(
            dimension_semantics=("parallel",),
            vmem_limit_bytes=vmem_limit),
        cost_estimate=cost,
    )(x_p, w1_p, b1_p, w2_p, b2_p, w3_p, b3_p)

    return out_padded[:B, :num_actions]


def policy_network_forward(state, prepared_params, block_batch=256):
    """3-layer MLP forward in one Pallas call, tiled over the batch.

    `prepared_params` comes from `prepare_policy_params` (pad/cast once)."""
    padded, num_actions = prepared_params
    return _policy_forward_impl(state, *padded,
                                num_actions=num_actions,
                                block_batch=block_batch)


# ---------------------------------------------------------------------------
# Init + pure-JAX reference (PyTorch-equivalent semantics)
# ---------------------------------------------------------------------------
def init_policy_params(key, num_inputs, num_actions, hidden_size, init_w=0.003):
    """Mirror PyTorch defaults:
       linear1/linear2: U(-1/sqrt(fan_in), 1/sqrt(fan_in)) for weight and bias,
       linear3: U(-init_w, init_w).  Weights stored transposed: (in, out)."""
    k1, k2, k3, k4, k5, k6 = jax.random.split(key, 6)

    bound1 = 1.0 / math.sqrt(num_inputs)
    w1 = jax.random.uniform(k1, (num_inputs, hidden_size), jnp.float32, -bound1, bound1)
    b1 = jax.random.uniform(k2, (1, hidden_size), jnp.float32, -bound1, bound1)

    bound2 = 1.0 / math.sqrt(hidden_size)
    w2 = jax.random.uniform(k3, (hidden_size, hidden_size), jnp.float32, -bound2, bound2)
    b2 = jax.random.uniform(k4, (1, hidden_size), jnp.float32, -bound2, bound2)

    w3 = jax.random.uniform(k5, (hidden_size, num_actions), jnp.float32, -init_w, init_w)
    b3 = jax.random.uniform(k6, (1, num_actions), jnp.float32, -init_w, init_w)

    return (w1, b1, w2, b2, w3, b3)


def reference_forward(state, params):
    """Pure-JAX f32 reference for correctness checking."""
    w1, b1, w2, b2, w3, b3 = params
    x = jnp.maximum(state @ w1 + b1, 0.0)
    x = jnp.maximum(x @ w2 + b2, 0.0)
    return jnp.tanh(x @ w3 + b3)


if __name__ == "__main__":
    # Small shapes consistent with the module: batch=8 states of dim 16,
    # hidden_size=32, 4 actions.
    batch, num_inputs, hidden_size, num_actions = 8, 16, 32, 4

    key = jax.random.PRNGKey(0)
    k_state, k_params, k_big = jax.random.split(key, 3)

    state = jax.random.normal(k_state, (batch, num_inputs), dtype=jnp.float32)
    params = init_policy_params(k_params, num_inputs, num_actions, hidden_size)
    ref = reference_forward(state, params)

    # 1) f32 path: exact semantics of the PyTorch module.
    prep_f32 = prepare_policy_params(params, compute_dtype=jnp.float32)
    out = jax.block_until_ready(policy_network_forward(state, prep_f32))
    assert out.shape == (batch, num_actions), out.shape
    assert out.dtype == jnp.float32
    assert jnp.allclose(out, ref, atol=1e-4, rtol=1e-4), "f32 mismatch vs reference"

    # 2) bf16 default path (MXU-native on v6e/v7x, f32 accumulation, bf16
    #    output writeback).  Weights are padded/cast once, reused per call.
    prep_bf16 = prepare_policy_params(params)  # default compute_dtype=bf16
    out_bf16 = jax.block_until_ready(policy_network_forward(state, prep_bf16))
    assert out_bf16.shape == (batch, num_actions)
    assert out_bf16.dtype == jnp.bfloat16
    assert jnp.allclose(out_bf16.astype(jnp.float32), ref,
                        atol=2e-2, rtol=2e-2), "bf16 mismatch"

    # 3) Larger batch exercises the multi-tile parallel grid (3 tiles at
    #    block_batch=128) with tight sublane-rounded tiles.
    big_state = jax.random.normal(k_big, (300, num_inputs), dtype=jnp.float32)
    ref_big = reference_forward(big_state, params)
    out_big = jax.block_until_ready(
        policy_network_forward(big_state, prep_f32, block_batch=128))
    assert out_big.shape == (300, num_actions)
    assert jnp.allclose(out_big, ref_big, atol=1e-4, rtol=1e-4), "tiled mismatch"

    # TODO(synk): get_action() is host-side numpy/device glue, not a kernel.
    print("KERNEL_OK")
</pallas_src>

<mosaic_0001>
module attributes {stable_mosaic.version = 11 : i64} {
  func.func @policy_mlp_kernel(%arg0: i32, %arg1: memref<8x128xf32, #tpu.memory_space<vmem>>, %arg2: memref<128x128xf32, #tpu.memory_space<vmem>>, %arg3: memref<1x128xf32, #tpu.memory_space<vmem>>, %arg4: memref<128x128xf32, #tpu.memory_space<vmem>>, %arg5: memref<1x128xf32, #tpu.memory_space<vmem>>, %arg6: memref<128x128xf32, #tpu.memory_space<vmem>>, %arg7: memref<1x128xf32, #tpu.memory_space<vmem>>, %arg8: memref<8x128xf32, #tpu.memory_space<vmem>>) attributes {dimension_semantics = [#tpu.dimension_semantics<parallel>], iteration_bounds = array<i64: 1>, scalar_prefetch = 0 : i64, scratch_operands = 0 : i64, tpu.core_type = #tpu.core_type<tc>, window_params = [{transform_indices = @transform_0, window_bounds = array<i64: 8, 128>}, {pipeline_mode = #tpu.pipeline_mode<synchronous>, transform_indices = @transform_1, window_bounds = array<i64: 128, 128>}, {pipeline_mode = #tpu.pipeline_mode<synchronous>, transform_indices = @transform_2, window_bounds = array<i64: 1, 128>}, {pipeline_mode = #tpu.pipeline_mode<synchronous>, transform_indices = @transform_3, window_bounds = array<i64: 128, 128>}, {pipeline_mode = #tpu.pipeline_mode<synchronous>, transform_indices = @transform_4, window_bounds = array<i64: 1, 128>}, {pipeline_mode = #tpu.pipeline_mode<synchronous>, transform_indices = @transform_5, window_bounds = array<i64: 128, 128>}, {pipeline_mode = #tpu.pipeline_mode<synchronous>, transform_indices = @transform_6, window_bounds = array<i64: 1, 128>}, {transform_indices = @transform_7, window_bounds = array<i64: 8, 128>}]} {
    %c0 = arith.constant 0 : index
    %c0_0 = arith.constant 0 : index
    %0 = vector.load %arg1[%c0, %c0_0] : memref<8x128xf32, #tpu.memory_space<vmem>>, vector<8x128xf32>
    %c0_1 = arith.constant 0 : index
    %c0_2 = arith.constant 0 : index
    %1 = vector.load %arg2[%c0_1, %c0_2] : memref<128x128xf32, #tpu.memory_space<vmem>>, vector<128x128xf32>
    %cst = arith.constant dense<0.000000e+00> : vector<8x128xf32>
    %2 = tpu.matmul %0, %1, %cst {dimension_numbers = #tpu.dot_dimension_numbers<[1], [0], [0], [1], [0, 0, 1, 1], [], []>} : vector<8x128xf32>, vector<128x128xf32>, vector<8x128xf32> -> vector<8x128xf32>
    %c0_3 = arith.constant 0 : index
    %c0_4 = arith.constant 0 : index
    %3 = vector.load %arg3[%c0_3, %c0_4] : memref<1x128xf32, #tpu.memory_space<vmem>>, vector<1x128xf32>
    %4 = vector.broadcast %3 : vector<1x128xf32> to vector<8x128xf32>
    %5 = arith.addf %2, %4 : vector<8x128xf32>
    %cst_5 = arith.constant 0.000000e+00 : f32
    %6 = vector.broadcast %cst_5 : f32 to vector<8x128xf32>
    %7 = arith.maximumf %5, %6 : vector<8x128xf32>
    %c0_6 = arith.constant 0 : index
    %c0_7 = arith.constant 0 : index
    %8 = vector.load %arg4[%c0_6, %c0_7] : memref<128x128xf32, #tpu.memory_space<vmem>>, vector<128x128xf32>
    %cst_8 = arith.constant dense<0.000000e+00> : vector<8x128xf32>
    %9 = tpu.matmul %7, %8, %cst_8 {dimension_numbers = #tpu.dot_dimension_numbers<[1], [0], [0], [1], [0, 0, 1, 1], [], []>} : vector<8x128xf32>, vector<128x128xf32>, vector<8x128xf32> -> vector<8x128xf32>
    %c0_9 = arith.constant 0 : index
    %c0_10 = arith.constant 0 : index
    %10 = vector.load %arg5[%c0_9, %c0_10] : memref<1x128xf32, #tpu.memory_space<vmem>>, vector<1x128xf32>
    %11 = vector.broadcast %10 : vector<1x128xf32> to vector<8x128xf32>
    %12 = arith.addf %9, %11 : vector<8x128xf32>
    %cst_11 = arith.constant 0.000000e+00 : f32
    %13 = vector.broadcast %cst_11 : f32 to vector<8x128xf32>
    %14 = arith.maximumf %12, %13 : vector<8x128xf32>
    %c0_12 = arith.constant 0 : index
    %c0_13 = arith.constant 0 : index
    %15 = vector.load %arg6[%c0_12, %c0_13] : memref<128x128xf32, #tpu.memory_space<vmem>>, vector<128x128xf32>
    %cst_14 = arith.constant dense<0.000000e+00> : vector<8x128xf32>
    %16 = tpu.matmul %14, %15, %cst_14 {dimension_numbers = #tpu.dot_dimension_numbers<[1], [0], [0], [1], [0, 0, 1, 1], [], []>} : vector<8x128xf32>, vector<128x128xf32>, vector<8x128xf32> -> vector<8x128xf32>
    %c0_15 = arith.constant 0 : index
    %c0_16 = arith.constant 0 : index
    %17 = vector.load %arg7[%c0_15, %c0_16] : memref<1x128xf32, #tpu.memory_space<vmem>>, vector<1x128xf32>
    %18 = vector.broadcast %17 : vector<1x128xf32> to vector<8x128xf32>
    %19 = arith.addf %16, %18 : vector<8x128xf32>
    %20 = math.tanh %19 : vector<8x128xf32>
    %c0_17 = arith.constant 0 : index
    %c0_18 = arith.constant 0 : index
    %21 = vector.load %arg8[%c0_17, %c0_18] : memref<8x128xf32, #tpu.memory_space<vmem>>, vector<8x128xf32>
    tpu.vector_store %arg8[%c0_17, %c0_18], %20 {strides = array<i32>} : memref<8x128xf32, #tpu.memory_space<vmem>>, vector<8x128xf32>,
    return
  }
  func.func @transform_0(%arg0: i32) -> (i32, i32) {
    %c0_i32 = arith.constant 0 : i32
    %c0_i32_0 = arith.constant 0 : i32
    return %arg0, %c0_i32 : i32, i32
  }
  func.func @transform_1(%arg0: i32) -> (i32, i32) {
    %c0_i32 = arith.constant 0 : i32
    %c0_i32_0 = arith.constant 0 : i32
    %c0_i32_1 = arith.constant 0 : i32
    return %c0_i32, %c0_i32_0 : i32, i32
  }
  func.func @transform_2(%arg0: i32) -> (i32, i32) {
    %c0_i32 = arith.constant 0 : i32
    %c0_i32_0 = arith.constant 0 : i32
    %c0_i32_1 = arith.constant 0 : i32
    return %c0_i32, %c0_i32_0 : i32, i32
  }
  func.func @transform_3(%arg0: i32) -> (i32, i32) {
    %c0_i32 = arith.constant 0 : i32
    %c0_i32_0 = arith.constant 0 : i32
    %c0_i32_1 = arith.constant 0 : i32
    return %c0_i32, %c0_i32_0 : i32, i32
  }
  func.func @transform_4(%arg0: i32) -> (i32, i32) {
    %c0_i32 = arith.constant 0 : i32
    %c0_i32_0 = arith.constant 0 : i32
    %c0_i32_1 = arith.constant 0 : i32
    return %c0_i32, %c0_i32_0 : i32, i32
  }
  func.func @transform_5(%arg0: i32) -> (i32, i32) {
    %c0_i32 = arith.constant 0 : i32
    %c0_i32_0 = arith.constant 0 : i32
    %c0_i32_1 = arith.constant 0 : i32
    return %c0_i32, %c0_i32_0 : i32, i32
  }
  func.func @transform_6(%arg0: i32) -> (i32, i32) {
    %c0_i32 = arith.constant 0 : i32
    %c0_i32_0 = arith.constant 0 : i32
    %c0_i32_1 = arith.constant 0 : i32
    return %c0_i32, %c0_i32_0 : i32, i32
  }
  func.func @transform_7(%arg0: i32) -> (i32, i32) {
    %c0_i32 = arith.constant 0 : i32
    %c0_i32_0 = arith.constant 0 : i32
    return %arg0, %c0_i32 : i32, i32
  }
}

</mosaic_0001>

<bundles_post_ra>
// kernel: _policy_forward_impl.1
= control target key start
LH: loop header
LB: loop body
LE: loop exit
PB: predicated region body
PF: predicated region fallthrough
CT: control target
= control target key end

     0   :  { %12 = vsyncpa [#allocation3], 0  ;;  %s714_s0 = inlined_call_operand.vmem [shape: f32[8,128], index: 0, kind: input, shape index: {}]   ;;  %s715_s1 = inlined_call_operand.hbm [shape: f32[128,128], index: 1, kind: input, shape index: {}]   ;;  %s716_s2 = inlined_call_operand.vmem [shape: f32[1,128], index: 2, kind: input, shape index: {}]   ;;  %s717_s3 = inlined_call_operand.hbm [shape: f32[128,128], index: 3, kind: input, shape index: {}]   ;;  %s718_s4 = inlined_call_operand.vmem [shape: f32[1,128], index: 4, kind: input, shape index: {}]   ;;  %s719_s5 = inlined_call_operand.hbm [shape: f32[128,128], index: 5, kind: input, shape index: {}]   ;;  %s720_s6 = inlined_call_operand.vmem [shape: f32[1,128], index: 6, kind: input, shape index: {}]   ;;  %s721_s7 = inlined_call_operand.vmem [shape: f32[8,128], index: 7, kind: output, shape index: {}]  }
   0x1   :  { %13 = vsyncpa [#allocation5], 0  ;;  %s589_s24 = smov [#allocation4]   ;;  %s590_s26 = smov [#allocation2]  }
   0x2   :  { %s35_s25 = sshll.u32 %s589_s24, 4  ;;  %s21_s27 = sshll.u32 %s590_s26, 4  ;;  %s36_s25 = int_to_ptr.vmem [resolvable:$true] %s35_s25  ;;  %s22_s27 = int_to_ptr.vmem [resolvable:$true] %s21_s27 }
   0x3   :  { %s533_s28 = scalar_lea.vmem %s36_s25, 2048  ;;  %p538_p1 = scmp.lt.s32.totalorder %s36_s25, %s36_s25 }
   0x4   :  { %p534_p0 = scmp.ne.s32.totalorder %s36_s25, %s533_s28  ;;  %p539_p2 = scmp.lt.s32.totalorder %s533_s28, %s533_s28 }
   0x6   :  { %p540_p3 = por %p539_p2, %p538_p1 }
   0x8   :  { %p541_p4 = pnand %p540_p3, %p534_p0 }
   0xa   :  { %544 = shalt.err (!%p541_p4)
}
   0xb   :  { %s591_s29 = smov 128   ;;  %s592_s30 = smov 8  }
   0xc   :  { %41 = dma.hbm_to_vmem [thread:$0]  %s717_s3, 2048, %s36_s25, [#allocation5], %s591_s29, %s591_s29, %s592_s30  }
   0xd   :  { %s553_s10 = scalar_lea.vmem %s22_s27, 2048  ;;  %p558_p6 = scmp.lt.s32.totalorder %s22_s27, %s22_s27 }
   0xe   :  { %p554_p5 = scmp.ne.s32.totalorder %s22_s27, %s553_s10  ;;  %p559_p7 = scmp.lt.s32.totalorder %s553_s10, %s553_s10 }
  0x10   :  { %p560_p8 = por %p559_p7, %p558_p6 }
  0x12   :  { %p561_p9 = pnand %p560_p8, %p554_p5 }
  0x14   :  { %564 = shalt.err (!%p561_p9)
}
  0x15   :  { %27 = dma.hbm_to_vmem [thread:$0]  %s715_s1, 2048, %s22_s27, [#allocation3], %s591_s29, %s591_s29, %s592_s30  }
  0x16   :  { %s593_s13 = smov [#allocation6]  }
  0x17   :  { %s49_s14 = sshll.u32 %s593_s13, 4  ;;  %s50_s14 = int_to_ptr.vmem [resolvable:$true] %s49_s14 }
  0x18   :  { %s573_s15 = scalar_lea.vmem %s50_s14, 2048  ;;  %p578_p11 = scmp.lt.s32.totalorder %s50_s14, %s50_s14 }
  0x19   :  { %p574_p10 = scmp.ne.s32.totalorder %s50_s14, %s573_s15  ;;  %p579_p12 = scmp.lt.s32.totalorder %s573_s15, %s573_s15 }
  0x1b   :  { %p580_p13 = por %p579_p12, %p578_p11 }
  0x1d   :  { %p581_p0 = pnand %p580_p13, %p574_p10 }
  0x1f   :  { %584 = shalt.err (!%p581_p0)
}
  0x20   :  { %55 = dma.hbm_to_vmem [thread:$0]  %s719_s5, 2048, %s50_s14, [#allocation5], %s591_s29, %s591_s29, %s592_s30  }
  0x21   :  { %585 = dma.done.wait [#allocation3], 2048  }
  0x22   :  { %586 = vsyncadd [#allocation3], 4294965248 }
  0x23   :  { %587 = dma.done.wait [#allocation5], 4096  }
  0x24   :  { %588 = vsyncadd [#allocation5], 4294963200  ;;  %v594_v0 = vmov 0.0   ;;  %vm595_vm0 = vmmov 0   ;;  %v83_v1 = vld [vmem:[#allocation2 + $0x78] sm:$0xff]  ;;  %v82_v2 = vld [vmem:[#allocation2 + $0x70] sm:$0xff] }
  0x25   :  { %411 = vmatprep.subr.mxu0 %v594_v0  ;;  %443 = vmatprep.mubr.msk.f32.mxu0 %vm595_vm0, %v594_v0  ;;  %v81_v3 = vld [vmem:[#allocation2 + $0x68] sm:$0xff]  ;;  %v80_v4 = vld [vmem:[#allocation2 + $0x60] sm:$0xff]  ;;  %v177_v5 = vld [vmem:[#allocation4 + $0x78] sm:$0xff] }
  0x26   :  { %446 = vmatprep.subr.mxu1 %v594_v0  ;;  %478 = vmatprep.mubr.msk.f32.mxu1 %vm595_vm0, %v594_v0  ;;  %v79_v6 = vld [vmem:[#allocation2 + $0x58] sm:$0xff]  ;;  %v176_v7 = vld [vmem:[#allocation4 + $0x70] sm:$0xff]  ;;  %v175_v8 = vld [vmem:[#allocation4 + $0x68] sm:$0xff] }
  0x27   :  { %412 = vmatpush3.msra.mxu0 %v83_v1  ;;  %447 = vmatpush3.msra.mxu1 %v177_v5  ;;  %v78_v9 = vld [vmem:[#allocation2 + $0x50] sm:$0xff]  ;;  %v174_v10 = vld [vmem:[#allocation4 + $0x60] sm:$0xff]  ;;  %v77_v11 = vld [vmem:[#allocation2 + $0x48] sm:$0xff] }
  0x28   :  { %413 = vmatprep.subr.mxu0 %v594_v0  ;;  %448 = vmatprep.subr.mxu1 %v594_v0  ;;  %v173_v12 = vld [vmem:[#allocation4 + $0x58] sm:$0xff]  ;;  %v76_v13 = vld [vmem:[#allocation2 + $0x40] sm:$0xff]  ;;  %v172_v14 = vld [vmem:[#allocation4 + $0x50] sm:$0xff] }
  0x29   :  { %414 = vmatpush3.msra.mxu0 %v82_v2  ;;  %449 = vmatpush3.msra.mxu1 %v176_v7  ;;  %v75_v15 = vld [vmem:[#allocation2 + $0x38] sm:$0xff]  ;;  %v171_v16 = vld [vmem:[#allocation4 + $0x48] sm:$0xff]  ;;  %v74_v17 = vld [vmem:[#allocation2 + $0x30] sm:$0xff] }
  0x2a   :  { %415 = vmatprep.subr.mxu0 %v594_v0  ;;  %450 = vmatprep.subr.mxu1 %v594_v0  ;;  %v170_v18 = vld [vmem:[#allocation4 + $0x40] sm:$0xff]  ;;  %v73_v19 = vld [vmem:[#allocation2 + $0x28] sm:$0xff]  ;;  %v169_v20 = vld [vmem:[#allocation4 + $0x38] sm:$0xff] }
  0x2b   :  { %416 = vmatpush3.msra.mxu0 %v81_v3  ;;  %451 = vmatpush3.msra.mxu1 %v175_v8  ;;  %v72_v21 = vld [vmem:[#allocation2 + $0x20] sm:$0xff]  ;;  %v168_v22 = vld [vmem:[#allocation4 + $0x30] sm:$0xff]  ;;  %v71_v23 = vld [vmem:[#allocation2 + $0x18] sm:$0xff] }
  0x2c   :  { %417 = vmatprep.subr.mxu0 %v594_v0  ;;  %452 = vmatprep.subr.mxu1 %v594_v0  ;;  %v167_v24 = vld [vmem:[#allocation4 + $0x28] sm:$0xff]  ;;  %v70_v25 = vld [vmem:[#allocation2 + $0x10] sm:$0xff]  ;;  %v166_v26 = vld [vmem:[#allocation4 + $0x20] sm:$0xff] }
  0x2d   :  { %418 = vmatpush3.msra.mxu0 %v80_v4  ;;  %453 = vmatpush3.msra.mxu1 %v174_v10  ;;  %v69_v27 = vld [vmem:[#allocation2 + $0x8] sm:$0xff]  ;;  %v165_v28 = vld [vmem:[#allocation4 + $0x18] sm:$0xff]  ;;  %v68_v29 = vld [vmem:[#allocation2] sm:$0xff] }
  0x2e   :  { %419 = vmatprep.subr.mxu0 %v594_v0  ;;  %454 = vmatprep.subr.mxu1 %v594_v0  ;;  %v67_v30 = vld [vmem:[%s714_s0] sm:$0xff]  ;;  %v164_v31 = vld [vmem:[#allocation4 + $0x10] sm:$0xff]  ;;  %v163_v32 = vld [vmem:[#allocation4 + $0x8] sm:$0xff] }
  0x2f   :  { %420 = vmatpush3.msra.mxu0 %v79_v6  ;;  %455 = vmatpush3.msra.mxu1 %v173_v12  ;;  %v162_v33 = vld [vmem:[#allocation4] sm:$0xff]  ;;  %v271_v34 = vld [vmem:[#allocation6 + $0x78] sm:$0xff]  ;;  %v270_v35 = vld [vmem:[#allocation6 + $0x70] sm:$0xff] }
  0x30   :  { %421 = vmatprep.subr.mxu0 %v594_v0  ;;  %456 = vmatprep.subr.mxu1 %v594_v0  ;;  %v269_v36 = vld [vmem:[#allocation6 + $0x68] sm:$0xff]  ;;  %v268_v37 = vld [vmem:[#allocation6 + $0x60] sm:$0xff]  ;;  %v267_v38 = vld [vmem:[#allocation6 + $0x58] sm:$0xff] }
  0x31   :  { %422 = vmatpush3.msra.mxu0 %v78_v9  ;;  %457 = vmatpush3.msra.mxu1 %v172_v14  ;;  %v266_v39 = vld [vmem:[#allocation6 + $0x50] sm:$0xff]  ;;  %v265_v40 = vld [vmem:[#allocation6 + $0x48] sm:$0xff]  ;;  %v264_v41 = vld [vmem:[#allocation6 + $0x40] sm:$0xff] }
  0x32   :  { %423 = vmatprep.subr.mxu0 %v594_v0  ;;  %458 = vmatprep.subr.mxu1 %v594_v0  ;;  %v263_v42 = vld [vmem:[#allocation6 + $0x38] sm:$0xff]  ;;  %v262_v43 = vld [vmem:[#allocation6 + $0x30] sm:$0xff]  ;;  %v261_v44 = vld [vmem:[#allocation6 + $0x28] sm:$0xff] }
  0x33   :  { %424 = vmatpush3.msra.mxu0 %v77_v11  ;;  %459 = vmatpush3.msra.mxu1 %v171_v16  ;;  %v260_v45 = vld [vmem:[#allocation6 + $0x20] sm:$0xff]  ;;  %v259_v46 = vld [vmem:[#allocation6 + $0x18] sm:$0xff]  ;;  %v258_v52 = vld [vmem:[#allocation6 + $0x10] sm:$0xff] }
  0x34   :  { %425 = vmatprep.subr.mxu0 %v594_v0  ;;  %460 = vmatprep.subr.mxu1 %v594_v0  ;;  %v357_v47 = vld [vmem:[%s716_s2] ss:$0 sm:$0xff]  ;;  %v257_v53 = vld [vmem:[#allocation6 + $0x8] sm:$0xff] }
  0x35   :  { %426 = vmatpush3.msra.mxu0 %v76_v13  ;;  %461 = vmatpush3.msra.mxu1 %v170_v18  ;;  %v256_v54 = vld [vmem:[#allocation6] sm:$0xff] }
  0x36   :  { %427 = vmatprep.subr.mxu0 %v594_v0  ;;  %462 = vmatprep.subr.mxu1 %v594_v0  ;;  %v358_v55 = vld [vmem:[%s718_s4] ss:$0 sm:$0xff] }
  0x37   :  { %428 = vmatpush3.msra.mxu0 %v75_v15  ;;  %463 = vmatpush3.msra.mxu1 %v169_v20  ;;  %v359_v60 = vld [vmem:[%s720_s6] ss:$0 sm:$0xff] }
  0x38   :  { %429 = vmatprep.subr.mxu0 %v594_v0  ;;  %464 = vmatprep.subr.mxu1 %v594_v0 }
  0x39   :  { %430 = vmatpush3.msra.mxu0 %v74_v17  ;;  %465 = vmatpush3.msra.mxu1 %v168_v22 }
  0x3a   :  { %431 = vmatprep.subr.mxu0 %v594_v0  ;;  %466 = vmatprep.subr.mxu1 %v594_v0 }
  0x3b   :  { %432 = vmatpush3.msra.mxu0 %v73_v19  ;;  %467 = vmatpush3.msra.mxu1 %v167_v24 }
  0x3c   :  { %433 = vmatprep.subr.mxu0 %v594_v0  ;;  %468 = vmatprep.subr.mxu1 %v594_v0 }
  0x3d   :  { %434 = vmatpush3.msra.mxu0 %v72_v21  ;;  %469 = vmatpush3.msra.mxu1 %v166_v26 }
  0x3e   :  { %435 = vmatprep.subr.mxu0 %v594_v0  ;;  %470 = vmatprep.subr.mxu1 %v594_v0 }
  0x3f   :  { %436 = vmatpush3.msra.mxu0 %v71_v23  ;;  %471 = vmatpush3.msra.mxu1 %v165_v28 }
  0x40   :  { %437 = vmatprep.subr.mxu0 %v594_v0  ;;  %472 = vmatprep.subr.mxu1 %v594_v0 }
  0x41   :  { %438 = vmatpush3.msra.mxu0 %v70_v25  ;;  %473 = vmatpush3.msra.mxu1 %v164_v31 }
  0x42   :  { %439 = vmatprep.subr.mxu0 %v594_v0  ;;  %474 = vmatprep.subr.mxu1 %v594_v0 }
  0x43   :  { %440 = vmatpush3.msra.mxu0 %v69_v27  ;;  %475 = vmatpush3.msra.mxu1 %v163_v32 }
  0x44   :  { %441 = vmatprep.subr.mxu0 %v594_v0  ;;  %476 = vmatprep.subr.mxu1 %v594_v0 }
  0x45   :  { %442 = vmatpush3.msra.mxu0 %v68_v29  ;;  %477 = vmatpush3.msra.mxu1 %v162_v33 }
  0x46   :  { %444 = vmatmul.mubr.f32.vlgmr.msra.gmra.mxu0 %v67_v30  ;;  %481 = vmatprep.subr.mxu0 %v594_v0 }
  0x47   :  { %513 = vmatprep.mubr.msk.f32.mxu0 %vm595_vm0, %v594_v0  ;;  %482 = vmatpush3.msra.mxu0 %v271_v34 }
  0x48   :  { %483 = vmatprep.subr.mxu0 %v594_v0 }
  0x49   :  { %484 = vmatpush3.msra.mxu0 %v270_v35 }
  0x4a   :  { %485 = vmatprep.subr.mxu0 %v594_v0 }
  0x4b   :  { %486 = vmatpush3.msra.mxu0 %v269_v36 }
  0x4c   :  { %487 = vmatprep.subr.mxu0 %v594_v0 }
  0x4d   :  { %488 = vmatpush3.msra.mxu0 %v268_v37 }
  0x4e   :  { %489 = vmatprep.subr.mxu0 %v594_v0 }
  0x4f   :  { %490 = vmatpush3.msra.mxu0 %v267_v38 }
  0x50   :  { %491 = vmatprep.subr.mxu0 %v594_v0 }
  0x51   :  { %492 = vmatpush3.msra.mxu0 %v266_v39 }
  0x52   :  { %493 = vmatprep.subr.mxu0 %v594_v0 }
  0x53   :  { %494 = vmatpush3.msra.mxu0 %v265_v40 }
  0x54   :  { %495 = vmatprep.subr.mxu0 %v594_v0 }
  0x55   :  { %496 = vmatpush3.msra.mxu0 %v264_v41 }
  0x56   :  { %497 = vmatprep.subr.mxu0 %v594_v0 }
  0x57   :  { %498 = vmatpush3.msra.mxu0 %v263_v42 }
  0x58   :  { %499 = vmatprep.subr.mxu0 %v594_v0 }
  0x59   :  { %500 = vmatpush3.msra.mxu0 %v262_v43 }
  0x5a   :  { %501 = vmatprep.subr.mxu0 %v594_v0 }
  0x5b   :  { %502 = vmatpush3.msra.mxu0 %v261_v44 }
  0x5c   :  { %503 = vmatprep.subr.mxu0 %v594_v0 }
  0x5d   :  { %504 = vmatpush3.msra.mxu0 %v260_v45 }
  0x5e   :  { %505 = vmatprep.subr.mxu0 %v594_v0 }
  0x5f   :  { %506 = vmatpush3.msra.mxu0 %v259_v46 }
  0x60   :  { %507 = vmatprep.subr.mxu0 %v594_v0 }
  0x61   :  { %508 = vmatpush3.msra.mxu0 %v258_v52 }
  0x62   :  { %509 = vmatprep.subr.mxu0 %v594_v0 }
  0x63   :  { %510 = vmatpush3.msra.mxu0 %v257_v53 }
  0x64   :  { %511 = vmatprep.subr.mxu0 %v594_v0 }
  0x65   :  { %512 = vmatpush3.msra.mxu0 %v256_v54 }
 0x106   :  { %v157_v48 = vpop.f32.mrf.mxu0 }
 0x107   :  { %v158_v49 = vadd.f32 %v357_v47, %v157_v48 }
 0x108   :  { %v445_v50 = vpop.f32.mrf.mxu0 }
 0x109   :  { %v161_v51 = vmax.f32 %v158_v49, 0.0 }
 0x10b   :  { %479 = vmatmul.mubr.f32.vlgmr.msra.gmra.mxu1 %v161_v51 }
 0x1cb   :  { %v251_v56 = vpop.f32.mrf.mxu1 }
 0x1cc   :  { %v252_v57 = vadd.f32 %v358_v55, %v251_v56 }
 0x1cd   :  { %v480_v58 = vpop.f32.mrf.mxu1 }
 0x1ce   :  { %v255_v59 = vmax.f32 %v252_v57, 0.0 }
 0x1d0   :  { %514 = vmatmul.mubr.f32.vlgmr.msra.gmra.mxu0 %v255_v59 }
 0x290   :  { %v345_v61 = vpop.f32.mrf.mxu0 }
 0x291   :  { %v346_v62 = vadd.f32 %v359_v60, %v345_v61 }
 0x292   :  { %v515_v63 = vpop.f32.mrf.mxu0 }
 0x293   :  { %523 = vtanh.f32 %v346_v62 }
 0x2a0   :  { %v524_v0 = vpop.eup %523 }
 0x2a1   :  { %350 = vst [vmem:[%s721_s7] sm:$0xff] %v524_v0 }
 0x2a2   :  { %355 = vsyncpa [#allocation3], 1 }
 0x2a3   :  { %356 = vsyncpa [#allocation5], 1 }

</bundles_post_ra>
